<compile_context>
chip_gen: v5e
topology: v5e:2x2
jax: 0.10.0
libtpu: 0.0.40
codegen_flags: <defaults>
</compile_context>

<pallas_src>
import functools

import jax
import jax.numpy as jnp
from jax import lax
from jax.experimental import pallas as pl
from jax.experimental.pallas import tpu as pltpu


def _kl_div_kernel(ys_ref, yt_ref, out_ref, *,
                   temperature, num_rows, block_b, mask_rows):
    """Compute this batch tile's partial sum of p_t * (log p_t - log p_s)."""
    inv_t = 1.0 / temperature
    s = ys_ref[...].astype(jnp.float32) * inv_t   # (block_b, C) student logits / T
    t = yt_ref[...].astype(jnp.float32) * inv_t   # (block_b, C) teacher logits / T

    if mask_rows:
        # Last tile may extend past B; force padded rows to zero logits.
        # Zero rows give identical uniform softmaxes -> contribution exactly 0.
        row0 = pl.program_id(0) * block_b
        rows = row0 + lax.broadcasted_iota(jnp.int32, (block_b, 1), 0)
        valid = rows < num_rows
        s = jnp.where(valid, s, 0.0)
        t = jnp.where(valid, t, 0.0)

    # Student log_softmax (numerically stable).
    s_shift = s - jnp.max(s, axis=-1, keepdims=True)
    log_ps = s_shift - jnp.log(jnp.sum(jnp.exp(s_shift), axis=-1, keepdims=True))

    # Teacher softmax + log_softmax, reusing the exponentials (one exp total).
    t_shift = t - jnp.max(t, axis=-1, keepdims=True)
    e_t = jnp.exp(t_shift)
    z_t = jnp.sum(e_t, axis=-1, keepdims=True)
    log_pt = t_shift - jnp.log(z_t)
    p_t = e_t * (1.0 / z_t)

    contrib = p_t * (log_pt - log_ps)
    # Single partial-sum scalar per tile; final batchmean/T^2 scaling happens
    # in the wrapper over the tiny (num_tiles,) vector.
    out_ref[...] = jnp.sum(contrib).reshape(1, 1, 1)


def _pick_block_b(B, C, in_dtype, vmem_budget_bytes=24 * 1024 * 1024):
    """Largest batch tile keeping 2 inputs x 2 pipeline buffers in budget."""
    itemsize = jnp.dtype(in_dtype).itemsize
    per_row_bytes = 4 * C * itemsize            # 2 inputs x 2 buffers
    bb = max(1, vmem_budget_bytes // per_row_bytes)
    bb = min(bb, 1024)
    # Sublane packing: f32 -> 8, bf16/f16 -> 16, int8/fp8 -> 32.
    mult = max(8, 32 // itemsize)
    if B <= bb or B <= mult:
        return int(B)                           # single tile; full dim is legal
    bb = max(mult, (bb // mult) * mult)
    return int(bb)


def kl_div_loss(y_s, y_t, temperature, *, block_b=None):
    """KLDiv(T).forward(y_s, y_t) with y_s, y_t of shape [B, C]."""
    assert y_s.shape == y_t.shape and y_s.ndim == 2
    B, C = y_s.shape
    if block_b is None:
        block_b = _pick_block_b(B, C, y_s.dtype)
    block_b = min(int(block_b), B)
    num_tiles = pl.cdiv(B, block_b)
    mask_rows = (B % block_b) != 0

    itemsize = jnp.dtype(y_s.dtype).itemsize
    vmem_needed = 4 * block_b * C * itemsize + (2 << 20)
    vmem_limit = int(min(max(vmem_needed, 32 << 20), 128 << 20))

    kernel = functools.partial(
        _kl_div_kernel,
        temperature=float(temperature),
        num_rows=B,
        block_b=block_b,
        mask_rows=mask_rows,
    )

    partials = pl.pallas_call(
        kernel,
        out_shape=jax.ShapeDtypeStruct((num_tiles, 1, 1), jnp.float32),
        grid_spec=pltpu.PrefetchScalarGridSpec(
            num_scalar_prefetch=0,
            grid=(num_tiles,),
            in_specs=[
                pl.BlockSpec((block_b, C), lambda i: (i, 0)),
                pl.BlockSpec((block_b, C), lambda i: (i, 0)),
            ],
            # One independent (1,1,1) partial per tile -> no cross-step
            # dependency -> grid axis can be "parallel" (v7x megacore).
            out_specs=pl.BlockSpec((1, 1, 1), lambda i: (i, 0, 0)),
        ),
        compiler_params=pltpu.CompilerParams(
            dimension_semantics=("parallel",),
            vmem_limit_bytes=vmem_limit,
        ),
    )(y_s, y_t)

    scale = (float(temperature) ** 2) / B
    return jnp.sum(partials) * scale


def _reference(y_s, y_t, temperature):
    """Pure-JAX reference matching F.kl_div(log_softmax, softmax, 'batchmean') * T^2."""
    log_ps = jax.nn.log_softmax(y_s / temperature, axis=1)
    log_pt = jax.nn.log_softmax(y_t / temperature, axis=1)
    p_t = jnp.exp(log_pt)
    return jnp.sum(p_t * (log_pt - log_ps)) / y_s.shape[0] * temperature ** 2


if __name__ == "__main__":
    T = 4.0

    # Test 1: small logits, single tile (block_b == B).
    B, C = 16, 128
    key = jax.random.PRNGKey(0)
    k_s, k_t = jax.random.split(key)
    y_s = jax.random.normal(k_s, (B, C), dtype=jnp.float32)
    y_t = jax.random.normal(k_t, (B, C), dtype=jnp.float32)

    loss = jax.block_until_ready(kl_div_loss(y_s, y_t, T))
    ref = jax.block_until_ready(_reference(y_s, y_t, T))
    assert jnp.allclose(loss, ref, rtol=1e-5, atol=1e-6), (loss, ref)

    # Test 2: ragged batch (B not divisible by block_b) exercises row masking
    # and the multi-tile parallel-partials path.
    B2 = 20
    k_s2, k_t2 = jax.random.split(jax.random.PRNGKey(1))
    y_s2 = jax.random.normal(k_s2, (B2, C), dtype=jnp.float32)
    y_t2 = jax.random.normal(k_t2, (B2, C), dtype=jnp.float32)

    loss2 = jax.block_until_ready(kl_div_loss(y_s2, y_t2, T, block_b=8))
    ref2 = jax.block_until_ready(_reference(y_s2, y_t2, T))
    assert jnp.allclose(loss2, ref2, rtol=1e-5, atol=1e-6), (loss2, ref2)

    print("KERNEL_OK")
</pallas_src>

<mosaic_0001>
module attributes {stable_mosaic.version = 11 : i64} {
  func.func @_kl_div_kernel(%arg0: i32, %arg1: memref<16x128xf32, #tpu.memory_space<vmem>>, %arg2: memref<16x128xf32, #tpu.memory_space<vmem>>, %arg3: memref<1x1x1xf32, #tpu.memory_space<vmem>>) attributes {dimension_semantics = [#tpu.dimension_semantics<parallel>], iteration_bounds = array<i64: 1>, scalar_prefetch = 0 : i64, scratch_operands = 0 : i64, tpu.core_type = #tpu.core_type<tc>, window_params = [{transform_indices = @transform_0, window_bounds = array<i64: 16, 128>}, {transform_indices = @transform_1, window_bounds = array<i64: 16, 128>}, {transform_indices = @transform_2, window_bounds = array<i64: 1, 1, 1>}]} {
    %c0 = arith.constant 0 : index
    %c0_0 = arith.constant 0 : index
    %0 = vector.load %arg1[%c0, %c0_0] : memref<16x128xf32, #tpu.memory_space<vmem>>, vector<16x128xf32>
    %cst = arith.constant 2.500000e-01 : f32
    %1 = vector.broadcast %cst : f32 to vector<16x128xf32>
    %2 = arith.mulf %0, %1 : vector<16x128xf32>
    %c0_1 = arith.constant 0 : index
    %c0_2 = arith.constant 0 : index
    %3 = vector.load %arg2[%c0_1, %c0_2] : memref<16x128xf32, #tpu.memory_space<vmem>>, vector<16x128xf32>
    %cst_3 = arith.constant 2.500000e-01 : f32
    %4 = vector.broadcast %cst_3 : f32 to vector<16x128xf32>
    %5 = arith.mulf %3, %4 : vector<16x128xf32>
    %cst_4 = arith.constant dense<0xFF800000> : vector<16xf32>
    %6 = vector.multi_reduction <maximumf>, %2, %cst_4 [1] : vector<16x128xf32> to vector<16xf32>
    %7 = vector.shape_cast %6 : vector<16xf32> to vector<16x1xf32>
    %8 = vector.broadcast %7 : vector<16x1xf32> to vector<16x128xf32>
    %9 = arith.subf %2, %8 : vector<16x128xf32>
    %10 = math.exp %9 : vector<16x128xf32>
    %cst_5 = arith.constant dense<0.000000e+00> : vector<16xf32>
    %11 = vector.multi_reduction <add>, %10, %cst_5 [1] : vector<16x128xf32> to vector<16xf32>
    %12 = vector.shape_cast %11 : vector<16xf32> to vector<16x1xf32>
    %13 = math.log %12 : vector<16x1xf32>
    %14 = vector.broadcast %13 : vector<16x1xf32> to vector<16x128xf32>
    %15 = arith.subf %9, %14 : vector<16x128xf32>
    %cst_6 = arith.constant dense<0xFF800000> : vector<16xf32>
    %16 = vector.multi_reduction <maximumf>, %5, %cst_6 [1] : vector<16x128xf32> to vector<16xf32>
    %17 = vector.shape_cast %16 : vector<16xf32> to vector<16x1xf32>
    %18 = vector.broadcast %17 : vector<16x1xf32> to vector<16x128xf32>
    %19 = arith.subf %5, %18 : vector<16x128xf32>
    %20 = math.exp %19 : vector<16x128xf32>
    %cst_7 = arith.constant dense<0.000000e+00> : vector<16xf32>
    %21 = vector.multi_reduction <add>, %20, %cst_7 [1] : vector<16x128xf32> to vector<16xf32>
    %22 = vector.shape_cast %21 : vector<16xf32> to vector<16x1xf32>
    %23 = math.log %22 : vector<16x1xf32>
    %24 = vector.broadcast %23 : vector<16x1xf32> to vector<16x128xf32>
    %25 = arith.subf %19, %24 : vector<16x128xf32>
    %cst_8 = arith.constant 1.000000e+00 : f32
    %26 = vector.broadcast %cst_8 : f32 to vector<16x1xf32>
    %27 = arith.divf %26, %22 : vector<16x1xf32>
    %28 = vector.broadcast %27 : vector<16x1xf32> to vector<16x128xf32>
    %29 = arith.mulf %20, %28 : vector<16x128xf32>
    %30 = arith.subf %25, %15 : vector<16x128xf32>
    %31 = arith.mulf %29, %30 : vector<16x128xf32>
    %32 = vector.shape_cast %31 : vector<16x128xf32> to vector<1x16x128xf32>
    %cst_9 = arith.constant dense<0.000000e+00> : vector<1xf32>
    %33 = vector.multi_reduction <add>, %32, %cst_9 [1, 2] : vector<1x16x128xf32> to vector<1xf32>
    %34 = vector.shape_cast %33 : vector<1xf32> to vector<1x1x1xf32>
    %35 = vector.extract %34[0, 0, 0] : f32 from vector<1x1x1xf32>
    %36 = vector.broadcast %35 : f32 to vector<1x1x1xf32>
    %c0_10 = arith.constant 0 : index
    %c0_11 = arith.constant 0 : index
    %c0_12 = arith.constant 0 : index
    %37 = vector.load %arg3[%c0_10, %c0_11, %c0_12] : memref<1x1x1xf32, #tpu.memory_space<vmem>>, vector<1x1x1xf32>
    tpu.vector_store %arg3[%c0_10, %c0_11, %c0_12], %36 {strides = array<i32>} : memref<1x1x1xf32, #tpu.memory_space<vmem>>, vector<1x1x1xf32>,
    return
  }
  func.func @transform_0(%arg0: i32) -> (i32, i32) {
    %c0_i32 = arith.constant 0 : i32
    %c0_i32_0 = arith.constant 0 : i32
    return %arg0, %c0_i32 : i32, i32
  }
  func.func @transform_1(%arg0: i32) -> (i32, i32) {
    %c0_i32 = arith.constant 0 : i32
    %c0_i32_0 = arith.constant 0 : i32
    return %arg0, %c0_i32 : i32, i32
  }
  func.func @transform_2(%arg0: i32) -> (i32, i32, i32) {
    %c0_i32 = arith.constant 0 : i32
    %c0_i32_0 = arith.constant 0 : i32
    %c0_i32_1 = arith.constant 0 : i32
    return %arg0, %c0_i32, %c0_i32_0 : i32, i32, i32
  }
}

</mosaic_0001>

<bundles_post_ra>
// kernel: tpu_custom_call.1
= control target key start
LH: loop header
LB: loop body
LE: loop exit
PB: predicated region body
PF: predicated region fallthrough
CT: control target
= control target key end

     0   :  { %7 = vsyncpa [#allocation3], 0  ;;  %s309_s0 = inlined_call_operand.hbm [shape: f32[16,128], index: 0, kind: input, shape index: {}]   ;;  %s310_s1 = inlined_call_operand.hbm [shape: f32[16,128], index: 1, kind: input, shape index: {}]   ;;  %s311_s2 = inlined_call_operand.hbm [shape: f32[1,1,1], index: 2, kind: output, shape index: {}]  }
   0x1   :  { %8 = vsyncpa [#allocation6], 0 }
   0x2   :  { %9 = vsyncpa [#allocation4], 0  ;;  %s14_s11 = sshll.u32 %s309_s0, 4  ;;  %s264_s12 = smov [#allocation2]   ;;  %s15_s11 = int_to_ptr.hbm [resolvable:$true] %s14_s11 }
   0x3   :  { %s16_s13 = sshll.u32 %s264_s12, 4  ;;  %s27_s16 = sshll.u32 %s310_s1, 4  ;;  %s17_s13 = int_to_ptr.vmem [resolvable:$true] %s16_s13  ;;  %s28_s16 = int_to_ptr.hbm [resolvable:$true] %s27_s16 }
   0x4   :  { %s265_s17 = smov 128   ;;  %s266_s18 = smov 8  }
   0x5   :  { %22 = dma.hbm_to_vmem [thread:$0]  %s15_s11, 256, %s17_s13, [#allocation3], %s265_s17, %s265_s17, %s266_s18  }
   0x6   :  { %s267_s19 = smov [#allocation5]  }
   0x7   :  { %s29_s20 = sshll.u32 %s267_s19, 4  ;;  %s30_s20 = int_to_ptr.vmem [resolvable:$true] %s29_s20 }
   0x8   :  { %35 = dma.hbm_to_vmem [thread:$0]  %s28_s16, 256, %s30_s20, [#allocation6], %s265_s17, %s265_s17, %s266_s18  }
   0x9   :  { %258 = dma.done.wait [#allocation3], 256  }
   0xa   :  { %259 = vsyncadd [#allocation3], 4294967040 }
   0xb   :  { %260 = dma.done.wait [#allocation6], 256  }
   0xc   :  { %261 = vsyncadd [#allocation6], 4294967040  ;;  %v48_v0 = vld [vmem:[#allocation5] sm:$0xff]  ;;  %v44_v1 = vld [vmem:[#allocation2] sm:$0xff]  ;;  %s148_s21 = sshll.u32 %s311_s2, 4  ;;  %s268_s22 = smov [#allocation7]   ;;  %s149_s21 = int_to_ptr.hbm [resolvable:$true] %s148_s21 }
   0xd   :  { %v50_v2 = vmul.f32 0.25, %v48_v0  ;;  %v46_v3 = vmul.f32 0.25, %v44_v1  ;;  %v49_v4 = vld [vmem:[#allocation5 + $0x8] sm:$0xff]  ;;  %v45_v5 = vld [vmem:[#allocation2 + $0x8] sm:$0xff]  ;;  %s146_s23 = sshll.u32 %s268_s22, 4  ;;  %vm139_vm8 = vcmask 0   ;;  %s147_s23 = int_to_ptr.vmem [resolvable:$true] %s146_s23 }
   0xe   :  { %v51_v6 = vmul.f32 0.25, %v49_v4  ;;  %v47_v7 = vmul.f32 0.25, %v45_v5 }
   0xf   :  { %72 = vmax.xlane.f32.xlu0 %v50_v2  ;;  %52 = vmax.xlane.f32.xlu1 %v46_v3 }
  0x17   :  { %74 = vmax.xlane.f32.xlu0 %v51_v6  ;;  %54 = vmax.xlane.f32.xlu1 %v47_v7 }
  0x82   :  { %v73_v8 = vpop.xlane.xlu0 %72  ;;  %v53_v9 = vpop.xlane.xlu1 %52 }
  0x83   :  { %v290_v10 = vsub.f32 %v50_v2, %v73_v8  ;;  %v292_v11 = vsub.f32 %v46_v3, %v53_v9 }
  0x85   :  { %v78_v12 = vmul.f32 1.442695, %v290_v10  ;;  %v58_v13 = vmul.f32 1.442695, %v292_v11 }
  0x87   :  { %166 = vpow2.f32 %v78_v12 }
  0x88   :  { %168 = vpow2.f32 %v58_v13 }
  0x8a   :  { %v75_v14 = vpop.xlane.xlu0 %74  ;;  %v55_v15 = vpop.xlane.xlu1 %54 }
  0x8b   :  { %v296_v16 = vsub.f32 %v51_v6, %v75_v14  ;;  %v298_v17 = vsub.f32 %v47_v7, %v55_v15 }
  0x8d   :  { %v167_v18 = vpop.eup %166  ;;  %v80_v19 = vmul.f32 1.442695, %v296_v16  ;;  %v60_v20 = vmul.f32 1.442695, %v298_v17 }
  0x8e   :  { %v169_v21 = vpop.eup %168  ;;  %82 = vadd.xlane.f32.xlu2 %v167_v18 }
  0x8f   :  { %170 = vpow2.f32 %v80_v19  ;;  %62 = vadd.xlane.f32.xlu0 %v169_v21 }
  0x90   :  { %172 = vpow2.f32 %v60_v20 }
  0x95   :  { %v171_v22 = vpop.eup %170 }
  0x96   :  { %v173_v23 = vpop.eup %172  ;;  %84 = vadd.xlane.f32.xlu2 %v171_v22 }
  0x97   :  { %64 = vadd.xlane.f32.xlu1 %v173_v23 }
 0x101   :  { %v83_v24 = vpop.xlane.xlu2 %82 }
 0x102   :  { %174 = vrcp.f32 %v83_v24  ;;  %v63_v25 = vpop.xlane.xlu0 %62  ;;  %v103_v36 = vand.u32 2147483648, %v83_v24  ;;  %vm97_vm1 = vweird.f32 %v83_v24  ;;  %v101_v39 = vand.u32 2147483647, %v83_v24 }
 0x103   :  { %176 = vlog2.f32 %v63_v25 }
 0x104   :  { %178 = vlog2.f32 %v83_v24  ;;  %v104_v47 = vor.u32 1.1754944e-38, %v103_v36  ;;  %vm102_vm3 = vcmp.eq.f32.partialorder %v101_v39, 8.507059e+37 }
 0x108   :  { %v175_v26 = vpop.eup %174 }
 0x109   :  { %v93_v27 = vmul.f32 %v175_v26, %v83_v24  ;;  %v85_v28 = vpop.xlane.xlu2 %84  ;;  %v177_v32 = vpop.eup %176  ;;  %vm98_vm0 = vweird.f32 %v175_v26 }
 0x10a   :  { %180 = vrcp.f32 %v85_v28  ;;  %v65_v29 = vpop.xlane.xlu1 %64  ;;  %v179_v33 = vpop.eup %178  ;;  %v67_v41 = vmul.f32 0.6931472, %v177_v32  ;;  %vm99_vm2 = vmor %vm97_vm1, %vm98_vm0  ;;  %v118_v48 = vand.u32 2147483648, %v85_v28  ;;  %v116_v50 = vand.u32 2147483647, %v85_v28 }
 0x10b   :  { %v94_v30 = vsub.f32 1.0, %v93_v27  ;;  %182 = vlog2.f32 %v65_v29  ;;  %v87_v42 = vmul.f32 0.6931472, %v179_v33  ;;  %vm112_vm5 = vweird.f32 %v85_v28 }
 0x10c   :  { %184 = vlog2.f32 %v85_v28  ;;  %v70_v51 = vsub.f32 %v292_v11, %v67_v41  ;;  %v119_v57 = vor.u32 1.1754944e-38, %v118_v48  ;;  %vm117_vm7 = vcmp.eq.f32.partialorder %v116_v50, 8.507059e+37 }
 0x10d   :  { %v95_v31 = vmul.f32 %v175_v26, %v94_v30  ;;  %v90_v54 = vsub.f32 %v290_v10, %v87_v42 }
 0x10f   :  { %v96_v34 = vadd.f32 %v175_v26, %v95_v31  ;;  %v124_v62 = vsub.f32 %v90_v54, %v70_v51 }
 0x110   :  { %v181_v35 = vpop.eup %180 }
 0x111   :  { %v183_v37 = vpop.eup %182  ;;  %v108_v38 = vmul.f32 %v181_v35, %v85_v28  ;;  %v100_v46 = vsel %vm99_vm2, %v175_v26, %v96_v34  ;;  %vm113_vm4 = vweird.f32 %v181_v35 }
 0x112   :  { %v185_v40 = vpop.eup %184  ;;  %v69_v44 = vmul.f32 0.6931472, %v183_v37  ;;  %v105_v52 = vsel %vm102_vm3, %v104_v47, %v100_v46  ;;  %vm114_vm6 = vmor %vm112_vm5, %vm113_vm4 }
 0x113   :  { %v109_v43 = vsub.f32 1.0, %v108_v38  ;;  %v89_v45 = vmul.f32 0.6931472, %v185_v40  ;;  %v122_v59 = vmul.f32 %v167_v18, %v105_v52 }
 0x114   :  { %v71_v53 = vsub.f32 %v298_v17, %v69_v44 }
 0x115   :  { %v110_v49 = vmul.f32 %v181_v35, %v109_v43  ;;  %v91_v55 = vsub.f32 %v296_v16, %v89_v45  ;;  %v126_v0 = vmul.f32 %v124_v62, %v122_v59 }
 0x117   :  { %v111_v56 = vadd.f32 %v181_v35, %v110_v49  ;;  %v125_v63 = vsub.f32 %v91_v55, %v71_v53 }
 0x119   :  { %v115_v58 = vsel %vm114_vm6, %v181_v35, %v111_v56 }
 0x11a   :  { %v120_v60 = vsel %vm117_vm7, %v119_v57, %v115_v58 }
 0x11b   :  { %v123_v61 = vmul.f32 %v171_v22, %v120_v60 }
 0x11d   :  { %v127_v1 = vmul.f32 %v125_v63, %v123_v61 }
 0x11f   :  { %v128_v2 = vadd.f32 %v127_v1, %v126_v0 }
 0x121   :  { %129 = vadd.xlane.f32.xlu2 %v128_v2 }
 0x194   :  { %v130_v3 = vpop.xlane.xlu2 %129 }
 0x195   :  { %v131_v4 = vrot.slane %v130_v3, 4 }
 0x197   :  { %v132_v5 = vadd.f32 %v131_v4, %v130_v3 }
 0x199   :  { %v133_v6 = vrot.slane %v132_v5, 2 }
 0x19b   :  { %v134_v7 = vadd.f32 %v133_v6, %v132_v5 }
 0x19d   :  { %v135_v8 = vrot.slane %v134_v7, 1 }
 0x19f   :  { %v136_v9 = vadd.f32 %v135_v8, %v134_v7 }
 0x1a1   :  { %159 = vpush %v136_v9 }
 0x1d2   :  { %s160_s24 = spop %159 }
 0x1d3   :  { %v138_v10 = vstv %s160_s24 }
 0x1d4   :  { %140 = vst.msk [vmem:[#allocation7] sm:$0x1] %vm139_vm8, %v138_v10 }
 0x1d5   :  { %151 = dma.vmem_to_hbm [thread:$0]  %s147_s23, 16, %s149_s21, [#allocation4]  }
 0x1d6   :  { %262 = dma.done.wait [#allocation4], 16  }
 0x1d7   :  { %263 = vsyncadd [#allocation4], 4294967280 }
 0x1d8   :  { %156 = vsyncpa [#allocation3], 1 }
 0x1d9   :  { %157 = vsyncpa [#allocation6], 1 }
 0x1da   :  { %158 = vsyncpa [#allocation4], 1 }

</bundles_post_ra>
